<compile_context>
chip_gen: v5e
topology: v5e:2x2
jax: 0.10.0
libtpu: 0.0.40
codegen_flags: <defaults>
</compile_context>

<pallas_src>
import functools

import jax
import jax.numpy as jnp
import numpy as np
from jax.experimental import pallas as pl
from jax.experimental.pallas import tpu as pltpu

LANE = 128
NODE_ALIGN = 512  # pad node dim so the large (512/1024/2048) tile candidates divide


def _round_up(x, m):
    return (x + m - 1) // m * m


def _pick_tile(dim, candidates, min_blocks=1):
    """Largest candidate dividing `dim` (preferring >= min_blocks grid blocks)."""
    for c in candidates:
        if dim % c == 0 and dim // c >= min_blocks:
            return c
    for c in candidates:
        if dim % c == 0:
            return c
    return dim


# --------------------------------------------------------------------------
# Generic fused kernel:
#   out = d_row ⊙ (act(L) @ R)  [+ bias]  [+ res_scale * ori]
# Used twice per GCNConv layer:
#   H  = d ⊙ (act(X) @ W)                  (feature transform, column-scale fold)
#   out = d ⊙ (A_hat @ H) + b [+ r*ori]    (aggregation, row-scale in epilogue)
# Grid: (i over out-row tiles, j over out-col tiles, k over contraction tiles)
# --------------------------------------------------------------------------
def _scaled_matmul_kernel(*args, multi_k, has_bias, has_residual, input_relu,
                          compute_dtype):
    if multi_k:
        args, acc_ref = args[:-1], args[-1]
    else:
        acc_ref = None
    args = list(args)
    res_ref = args.pop(0) if has_residual else None   # scalar prefetch (SMEM)
    lhs_ref = args.pop(0)
    rhs_ref = args.pop(0)
    d_ref = args.pop(0)
    b_ref = args.pop(0) if has_bias else None
    ori_ref = args.pop(0) if has_residual else None
    (o_ref,) = args

    k = pl.program_id(2)

    dot_kwargs = dict(preferred_element_type=jnp.float32)
    if np.dtype(compute_dtype) == np.dtype(jnp.float32):
        # Full-precision MXU passes for the f32 verification path.
        dot_kwargs["precision"] = jax.lax.Precision.HIGHEST

    lhs = lhs_ref[...]
    if input_relu:
        lhs = jnp.maximum(lhs, 0)                      # relu on conv2's *input*
    if lhs.dtype != np.dtype(compute_dtype):
        lhs = lhs.astype(compute_dtype)                # e.g. int8 adjacency -> bf16 (1 op)
    rhs = rhs_ref[...]
    if rhs.dtype != np.dtype(compute_dtype):
        rhs = rhs.astype(compute_dtype)

    contrib = jnp.dot(lhs, rhs, **dot_kwargs)          # (tm, tn) f32 on the MXU

    def epilogue(acc):
        out = d_ref[...] * acc                         # D^{-1/2} row scale, once per tile
        if has_bias:
            out = out + b_ref[...]
        if has_residual:
            out = out + res_ref[0] * ori_ref[...].astype(jnp.float32)
        o_ref[...] = out.astype(o_ref.dtype)

    if multi_k:
        @pl.when(k == 0)
        def _():
            acc_ref[...] = jnp.zeros_like(acc_ref)

        acc_ref[...] += contrib

        @pl.when(k == pl.num_programs(2) - 1)
        def _():
            epilogue(acc_ref[...])
    else:
        # Single contraction step: write straight to the output, no scratch.
        epilogue(contrib)


def fused_scaled_matmul(lhs, rhs, d_row, *, bias=None, ori=None, res_scale=None,
                        input_relu=False, compute_dtype=jnp.bfloat16,
                        out_dtype=jnp.float32,
                        m_tile_candidates=(512, 256, 128),
                        k_tile_candidates=(2048, 1024, 512, 256, 128)):
    """out = d_row * (act(lhs) @ rhs) [+ bias] [+ res_scale*ori].  Shapes pre-padded."""
    m, kdim = lhs.shape
    n = rhs.shape[1]
    has_bias = bias is not None
    has_residual = ori is not None
    assert (res_scale is not None) == has_residual

    # >=2 row blocks so v7x's two TensorCores both get work; 256/512 blocks keep the
    # v6e/v7x 256x256 MXU fed; big tk -> long DMAs, few grid steps.
    tm = _pick_tile(m, m_tile_candidates, min_blocks=2)
    tk = _pick_tile(kdim, k_tile_candidates)
    tn = n if n <= 512 else _pick_tile(n, (512, 256, 128))
    grid = (m // tm, n // tn, kdim // tk)
    multi_k = grid[2] > 1

    in_specs = [
        pl.BlockSpec((tm, tk), lambda i, j, k, *_: (i, k)),   # lhs (A_hat or X)
        pl.BlockSpec((tk, tn), lambda i, j, k, *_: (k, j)),   # rhs (H or W)
        pl.BlockSpec((tm, 1), lambda i, j, k, *_: (i, 0)),    # D^{-1/2} (output rows)
    ]
    operands = [lhs, rhs, d_row]
    if has_bias:
        in_specs.append(pl.BlockSpec((1, tn), lambda i, j, k, *_: (0, j)))
        operands.append(bias)
    if has_residual:
        in_specs.append(pl.BlockSpec((tm, tn), lambda i, j, k, *_: (i, j)))
        operands.append(ori)
        operands = [res_scale] + operands          # res_scale lives in SMEM (no recompile)
        num_prefetch = 1
    else:
        num_prefetch = 0

    scratch = [pltpu.VMEM((tm, tn), jnp.float32)] if multi_k else []

    # Explicit VMEM budget (double-buffered working set; v7x has 64 MiB physical,
    # 32 MiB default scoped — keep well under it, with headroom above our need).
    out_bpe = np.dtype(out_dtype).itemsize
    working = 2 * (tm * tk * lhs.dtype.itemsize + tk * tn * rhs.dtype.itemsize
                   + tm * tn * out_bpe + tm * 4)
    if has_bias:
        working += 2 * tn * 4
    if has_residual:
        working += 2 * tm * tn * ori.dtype.itemsize
    if multi_k:
        working += tm * tn * 4
    vmem_limit = int(min(max(2 * working, 16 * 2**20), 48 * 2**20))

    flops = 2 * m * kdim * n
    bytes_accessed = (m * kdim * lhs.dtype.itemsize
                      + kdim * n * rhs.dtype.itemsize * grid[0]
                      + m * n * out_bpe
                      + (m * n * ori.dtype.itemsize if has_residual else 0))

    kernel = functools.partial(
        _scaled_matmul_kernel, multi_k=multi_k, has_bias=has_bias,
        has_residual=has_residual, input_relu=input_relu,
        compute_dtype=compute_dtype)

    return pl.pallas_call(
        kernel,
        out_shape=jax.ShapeDtypeStruct((m, n), out_dtype),
        grid_spec=pltpu.PrefetchScalarGridSpec(
            num_scalar_prefetch=num_prefetch,
            grid=grid,
            in_specs=in_specs,
            out_specs=pl.BlockSpec((tm, tn), lambda i, j, k, *_: (i, j)),
            scratch_shapes=scratch),
        compiler_params=pltpu.CompilerParams(
            dimension_semantics=("parallel", "parallel", "arbitrary"),
            vmem_limit_bytes=vmem_limit),
        cost_estimate=pl.CostEstimate(flops=int(flops), transcendentals=0,
                                      bytes_accessed=int(bytes_accessed)),
    )(*operands)


# --------------------------------------------------------------------------
# Model glue (plain JAX): padding, A+I, degree vector, layer loop
# --------------------------------------------------------------------------
def gcn_with_feature_forward(adj, in_feat, params, *, prop_step=2, residual=0.0,
                             relu=False, norm=False, compute_dtype=jnp.bfloat16,
                             m_tile_candidates=(512, 256, 128),
                             k_tile_candidates=(2048, 1024, 512, 256, 128)):
    if norm:
        # TODO(synk): norm=True path (LayerNorm + Dropout) not implemented.
        raise NotImplementedError("norm=True (LayerNorm/Dropout) not implemented")

    n = adj.shape[0]
    f_in = in_feat.shape[1]
    f_out = params["w1"].shape[1]
    n_pad = _round_up(n, NODE_ALIGN)          # big tile candidates divide
    f_in_pad = _round_up(f_in, LANE)
    f_out_pad = _round_up(f_out, LANE)

    # Zero-pad node & feature dims.  Padded rows/cols never influence real nodes (zero
    # adjacency links, zero feature/weight rows) and are sliced off at the end.
    adj_p = jnp.pad(adj, ((0, n_pad - n), (0, n_pad - n)))
    x_p = jnp.pad(in_feat, ((0, n_pad - n), (0, f_in_pad - f_in)))
    w1 = jnp.pad(params["w1"], ((0, f_in_pad - f_in), (0, f_out_pad - f_out)))
    w2 = jnp.pad(params["w2"], ((0, f_out_pad - f_out), (0, f_out_pad - f_out)))
    b1 = jnp.pad(params["b1"], ((0, 0), (0, f_out_pad - f_out))).astype(jnp.float32)
    b2 = jnp.pad(params["b2"], ((0, 0), (0, f_out_pad - f_out))).astype(jnp.float32)

    # Host-side normalization fold:
    #   A_hat = A + I  (exact integer values; identity on padded diag keeps deg >= 1)
    #   d = deg^{-1/2}; the column scale is folded into H, the row scale into the
    #   aggregation epilogue.  A_norm is never materialized.
    a_hat = adj_p + jnp.eye(n_pad, dtype=adj_p.dtype)
    deg = jnp.sum(a_hat, axis=1)
    d = (1.0 / jnp.sqrt(deg)).astype(jnp.float32)[:, None]        # (n_pad, 1)

    # Adjacency storage: int8 when exactly representable (binary graphs) -> halves the
    # dominant HBM stream vs bf16; in-kernel cast is hidden under the memory stall.
    try:
        int8_exact = bool(jnp.all(a_hat == a_hat.astype(jnp.int8).astype(a_hat.dtype)))
    except jax.errors.ConcretizationTypeError:   # wrapper traced under jit
        int8_exact = False
    a_store = a_hat.astype(jnp.int8) if int8_exact else a_hat.astype(compute_dtype)

    # MXU-side dtypes (cast in the wrapper so the kernels stream narrow data).
    x_p = x_p.astype(compute_dtype)
    w1 = w1.astype(compute_dtype)
    w2 = w2.astype(compute_dtype)

    res_arr = jnp.full((1,), float(residual), jnp.float32)
    use_residual = float(residual) != 0.0
    tile_kw = dict(m_tile_candidates=m_tile_candidates,
                   k_tile_candidates=k_tile_candidates)

    def conv(x, w, b, *, ori=None, input_relu=False, out_dtype=jnp.float32):
        # H = d ⊙ (act(x) @ w)  — computed once per layer, stored in compute dtype.
        h = fused_scaled_matmul(x, w, d, input_relu=input_relu,
                                compute_dtype=compute_dtype,
                                out_dtype=compute_dtype, **tile_kw)
        # out = d ⊙ (A_hat @ H) + b [+ residual * ori]
        return fused_scaled_matmul(a_store, h, d, bias=b,
                                   ori=ori, res_scale=res_arr if ori is not None else None,
                                   compute_dtype=compute_dtype,
                                   out_dtype=out_dtype, **tile_kw)

    # Intermediate activations (incl. `ori`) stay in compute dtype; final layer in f32.
    x = conv(x_p, w1, b1,
             out_dtype=(compute_dtype if prop_step > 1 else jnp.float32))
    ori = x
    for step in range(prop_step - 1):
        last = step == prop_step - 2
        x = conv(x, w2, b2,
                 ori=ori if use_residual else None,
                 input_relu=relu,
                 out_dtype=(jnp.float32 if last else compute_dtype))
    return x[:n, :f_out]


def init_params(key, in_feats, h_feats):
    """Deterministic glorot-uniform weights, zero biases (GCNConv defaults)."""
    k1, k2 = jax.random.split(key)

    def glorot(k, fan_in, fan_out):
        lim = np.sqrt(6.0 / (fan_in + fan_out))
        return jax.random.uniform(k, (fan_in, fan_out), jnp.float32, -lim, lim)

    return {
        "w1": glorot(k1, in_feats, h_feats),
        "b1": jnp.zeros((1, h_feats), jnp.float32),
        "w2": glorot(k2, h_feats, h_feats),
        "b2": jnp.zeros((1, h_feats), jnp.float32),
    }


def reference_forward(adj, in_feat, params, *, prop_step, residual, relu):
    """Pure-JAX f32 reference with the module's exact semantics."""
    n = adj.shape[0]
    a_hat = adj + jnp.eye(n, dtype=adj.dtype)
    deg = jnp.sum(a_hat, axis=1)
    dd = 1.0 / jnp.sqrt(deg)
    a_norm = dd[:, None] * a_hat * dd[None, :]
    x = a_norm @ (in_feat @ params["w1"]) + params["b1"]
    ori = x
    for _ in range(prop_step - 1):
        h = jnp.maximum(x, 0.0) if relu else x
        x = a_norm @ (h @ params["w2"]) + params["b2"] + residual * ori
    return x


# --------------------------------------------------------------------------
# Main
# --------------------------------------------------------------------------
if __name__ == "__main__":
    def make_inputs(key, n_nodes, in_feats, h_feats, p_edge=0.05):
        k_adj, k_feat, k_param = jax.random.split(key, 3)
        a_rand = jax.random.uniform(k_adj, (n_nodes, n_nodes), jnp.float32)
        adj = (a_rand < p_edge).astype(jnp.float32)
        adj = jnp.maximum(adj, adj.T) * (1.0 - jnp.eye(n_nodes, dtype=jnp.float32))
        feat = jax.random.normal(k_feat, (n_nodes, in_feats), jnp.float32)
        params = init_params(k_param, in_feats, h_feats)
        return adj, feat, params

    # --- main demo: non-divisible shapes, residual + relu, bf16 MXU / int8 adjacency ---
    N_NODES, IN_FEATS, H_FEATS = 200, 48, 32
    PROP_STEP, RESIDUAL, RELU = 3, 0.5, True
    adj, feat, params = make_inputs(jax.random.PRNGKey(0), N_NODES, IN_FEATS, H_FEATS)

    out = gcn_with_feature_forward(adj, feat, params, prop_step=PROP_STEP,
                                   residual=RESIDUAL, relu=RELU,
                                   compute_dtype=jnp.bfloat16)
    out = jax.block_until_ready(out)
    assert out.shape == (N_NODES, H_FEATS)

    ref = reference_forward(adj, feat, params, prop_step=PROP_STEP,
                            residual=RESIDUAL, relu=RELU)
    # bf16 MXU + bf16 intermediate activations -> loose tolerance vs pure-f32 ref.
    np.testing.assert_allclose(np.asarray(out), np.asarray(ref), rtol=5e-2, atol=5e-2)

    # --- exactness of the wiring (padding, host-folded normalization, self loops,
    #     int8 adjacency, bias/residual/relu epilogue) with f32 MXU passes ---
    out_f32 = gcn_with_feature_forward(adj, feat, params, prop_step=PROP_STEP,
                                       residual=RESIDUAL, relu=RELU,
                                       compute_dtype=jnp.float32)
    out_f32 = jax.block_until_ready(out_f32)
    np.testing.assert_allclose(np.asarray(out_f32), np.asarray(ref),
                               rtol=5e-4, atol=5e-4)

    # --- multi-K-step accumulator path (pl.when init/finalize) + residual + relu,
    #     forced by small k-tile candidates on a larger padded graph ---
    adj3, feat3, params3 = make_inputs(jax.random.PRNGKey(0), 600, 48, 32)
    out3 = gcn_with_feature_forward(adj3, feat3, params3, prop_step=3,
                                    residual=0.25, relu=True,
                                    compute_dtype=jnp.float32,
                                    k_tile_candidates=(256, 128))
    out3 = jax.block_until_ready(out3)
    ref3 = reference_forward(adj3, feat3, params3, prop_step=3,
                             residual=0.25, relu=True)
    np.testing.assert_allclose(np.asarray(out3), np.asarray(ref3),
                               rtol=5e-4, atol=5e-4)

    print("KERNEL_OK")
</pallas_src>

<mosaic_0001>
module attributes {stable_mosaic.version = 11 : i64} {
  func.func @_scaled_matmul_kernel(%arg0: i32, %arg1: i32, %arg2: i32, %arg3: memref<256x128xbf16, #tpu.memory_space<vmem>>, %arg4: memref<128x128xbf16, #tpu.memory_space<vmem>>, %arg5: memref<256x1xf32, #tpu.memory_space<vmem>>, %arg6: memref<256x128xbf16, #tpu.memory_space<vmem>>) attributes {dimension_semantics = [#tpu.dimension_semantics<parallel>, #tpu.dimension_semantics<parallel>, #tpu.dimension_semantics<arbitrary>], iteration_bounds = array<i64: 2, 1, 1>, scalar_prefetch = 0 : i64, scratch_operands = 0 : i64, tpu.core_type = #tpu.core_type<tc>, window_params = [{transform_indices = @transform_0, window_bounds = array<i64: 256, 128>}, {transform_indices = @transform_1, window_bounds = array<i64: 128, 128>}, {transform_indices = @transform_2, window_bounds = array<i64: 256, 1>}, {transform_indices = @transform_3, window_bounds = array<i64: 256, 128>}]} {
    %c0 = arith.constant 0 : index
    %c0_0 = arith.constant 0 : index
    %0 = vector.load %arg3[%c0, %c0_0] : memref<256x128xbf16, #tpu.memory_space<vmem>>, vector<256x128xbf16>
    %c0_1 = arith.constant 0 : index
    %c0_2 = arith.constant 0 : index
    %1 = vector.load %arg4[%c0_1, %c0_2] : memref<128x128xbf16, #tpu.memory_space<vmem>>, vector<128x128xbf16>
    %cst = arith.constant dense<0.000000e+00> : vector<256x128xf32>
    %2 = tpu.matmul %0, %1, %cst {dimension_numbers = #tpu.dot_dimension_numbers<[1], [0], [0], [1], [0, 0, 1, 1], [], []>} : vector<256x128xbf16>, vector<128x128xbf16>, vector<256x128xf32> -> vector<256x128xf32>
    %c0_3 = arith.constant 0 : index
    %c0_4 = arith.constant 0 : index
    %3 = vector.load %arg5[%c0_3, %c0_4] : memref<256x1xf32, #tpu.memory_space<vmem>>, vector<256x1xf32>
    %4 = vector.broadcast %3 : vector<256x1xf32> to vector<256x128xf32>
    %5 = arith.mulf %4, %2 : vector<256x128xf32>
    %6 = arith.truncf %5 : vector<256x128xf32> to vector<256x128xbf16>
    %c0_5 = arith.constant 0 : index
    %c0_6 = arith.constant 0 : index
    %7 = vector.load %arg6[%c0_5, %c0_6] : memref<256x128xbf16, #tpu.memory_space<vmem>>, vector<256x128xbf16>
    tpu.vector_store %arg6[%c0_5, %c0_6], %6 {strides = array<i32>} : memref<256x128xbf16, #tpu.memory_space<vmem>>, vector<256x128xbf16>,
    return
  }
  func.func @transform_0(%arg0: i32, %arg1: i32, %arg2: i32) -> (i32, i32) {
    %c0_i32 = arith.constant 0 : i32
    return %arg0, %arg2 : i32, i32
  }
  func.func @transform_1(%arg0: i32, %arg1: i32, %arg2: i32) -> (i32, i32) {
    %c0_i32 = arith.constant 0 : i32
    return %arg2, %arg1 : i32, i32
  }
  func.func @transform_2(%arg0: i32, %arg1: i32, %arg2: i32) -> (i32, i32) {
    %c0_i32 = arith.constant 0 : i32
    %c0_i32_0 = arith.constant 0 : i32
    return %arg0, %c0_i32 : i32, i32
  }
  func.func @transform_3(%arg0: i32, %arg1: i32, %arg2: i32) -> (i32, i32) {
    %c0_i32 = arith.constant 0 : i32
    return %arg0, %arg1 : i32, i32
  }
}

</mosaic_0001>

<bundles_post_ra>
// kernel: tpu_custom_call.1
= control target key start
LH: loop header
LB: loop body
LE: loop exit
PB: predicated region body
PF: predicated region fallthrough
CT: control target
= control target key end

     0   :  { %8 = vsyncpa [#allocation3], 0  ;;  %s1605_s0 = inlined_call_operand.vmem [shape: bf16[512,128], index: 0, kind: input, shape index: {}]   ;;  %s1606_s1 = inlined_call_operand.vmem [shape: bf16[128,128], index: 1, kind: input, shape index: {}]   ;;  %s1607_s2 = inlined_call_operand.vmem [shape: f32[512,1], index: 2, kind: input, shape index: {}]   ;;  %s1608_s3 = inlined_call_operand.hbm [shape: bf16[512,128], index: 3, kind: output, shape index: {}]  }
   0x1   :  { %10 = vsyncpa [#allocation3 + $0x1], 0  ;;  %s1373_s12 = smov 0   ;;  %s1375_s13 = smov 0  }
   0x2   :  { %s1377_s14 = smov 0   ;;  %s1379_s15 = smov 0  }
   0x3   :  { %s1381_s16 = smov 0   ;;  %s1383_s17 = smov 0  }
   0x4 LB: > { %s953_s18 = sadd.s32 4294967295, %s1348_s17   ;;  %s954_s19 = sadd.s32 4294967294, %s1348_s17   ;;  %s1348_s17 = sphi %s1383_s17, %s16_s17   ;;  %s1344_s16 = sphi %s1381_s16, %s1615_s16   ;;  %s1340_s15 = sphi %s1379_s15, %s1614_s15   ;;  %s1336_s14 = sphi %s1377_s14, %s1613_s14   ;;  %s1332_s13 = sphi %s1375_s13, %s1612_s13   ;;  %s1328_s12 = sphi %s1373_s12, %s1611_s12  }
   0x5   : > { %s35_s20 = sadd.s32 1, %s1344_s16  ;;  %s126_s21 = sadd.s32 1, %s1336_s14 }
   0x6   : > { %p37_p0 = scmp.ge.s32.totalorder %s35_s20, 2  ;;  %p136_p1 = scmp.ne.s32.totalorder %s1336_s14, %s1332_s13 }
   0x7   : > { %p137_p2 = scmp.eq.s32.totalorder %s953_s18, 1  ;;  %p142_p3 = scmp.ne.s32.totalorder %s1332_s13, %s1328_s12 }
   0x8   : > { %s1617_s20 = smov (%p37_p0, %s35_s20), 0  ;;  %p143_p5 = scmp.eq.s32.totalorder %s954_s19, 1 }
   0x9   : > { %p1413_p4 = por %p137_p2, %p136_p1  ;;  %s121_s23 = ssub.s32 %s1344_s16, %s1617_s20 }
   0xa   : > { %p958_p6 = scmp.ge.s32.totalorder %s1348_s17, 1  ;;  %p124_p7 = scmp.eq.s32.totalorder %s121_s23, 0 }
   0xb   : > { %p1420_p8 = por %p143_p5, %p142_p3  ;;  %p194_p9 = scmp.lt.s32.totalorder %s1348_s17, 3 }
   0xc   : > { %s1426_s25 = scalar_select %p124_p7, %s1336_s14, %s126_s21  }
   0xd   : > { %p195_p10 = pnand %p958_p6, %p194_p9 }
   0xe   : > { %s960_s28 = sshll.u32 (!%p195_p10), %s1340_s15, 5  ;;  %s1089_s10 = sshll.u32 (!%p195_p10), %s1340_s15, 7 }
   0xf   : > { %198 = sbr.rel (%p195_p10) target bundleno = 251 (0xfb), region = 32  ;;  %p235_p11 = scmp.lt.s32.totalorder (!%p195_p10), %s960_s28, 63 }
  0x10   : > { %s841_s19 = scalar_lea.hbm (!%p195_p10), %s1608_s3, %s1089_s10 }
  0x11   : > { %s844_s23 = sshll.u32 (!%p195_p10), %s841_s19, 4  ;;  %s845_s23 = int_to_ptr.hbm [resolvable:$true] %s844_s23 }
  0x12   : > { %s1284_s26 = sshra.s32 (!%p195_p10), %s845_s23, 4  ;;  %s1285_s26 = int_to_ptr.hbm [resolvable:$true] %s1284_s26 }
  0x13   : > { %s1286_s27 = scalar_lea.hbm (!%p195_p10), %s1285_s26, 128  ;;  %p1291_p1 = scmp.lt.s32.totalorder (!%p195_p10), %s1285_s26, %s1608_s3 }
  0x14   : > { %v1088_v0 = vld [vmem:[%s1606_s1 + $0x38] sm:$0xff]  ;;  %v1350_v1 = vmov 0   ;;  %v1087_v2 = vld [vmem:[%s1606_s1 + $0x30] sm:$0xff]  ;;  %s1619_s28 = smov (!%p235_p11, %s960_s28), 63  ;;  %v1086_v3 = vld [vmem:[%s1606_s1 + $0x28] sm:$0xff]  ;;  %p1287_p12 = scmp.ne.s32.totalorder %s1285_s26, %s1286_s27 }
  0x15   : > { %1269 = vset.pattern.permute.xlu2 %v1350_v1  ;;  %1268 = vset.pattern.permute.xlu1 %v1350_v1  ;;  %s963_s4 = sshll.u32 %s1619_s28, 3  ;;  %v1085_v7 = vld [vmem:[%s1606_s1 + $0x20] sm:$0xff]  ;;  %v1084_v11 = vld [vmem:[%s1606_s1 + $0x18] sm:$0xff]  ;;  %v1083_v12 = vld [vmem:[%s1606_s1 + $0x10] sm:$0xff]  ;;  %s961_s29 = sshll.u32 %s1619_s28, 2 }
  0x16   : > { %451 = vmatpush.bf16.msra.mxu0 %v1088_v0  ;;  %1185 = vmatpush.bf16.msra.mxu1 %v1088_v0  ;;  %s1441_s7 = scalar_lea.vmem %s1607_s2, %s963_s4  ;;  %v1082_v16 = vld [vmem:[%s1606_s1 + $0x8] sm:$0xff]  ;;  %v1081_v17 = vld [vmem:[%s1606_s1] sm:$0xff]  ;;  %s1474_s8 = scalar_lea.vmem %s1605_s0, %s961_s29 }
  0x17   : > { %1186 = vmatpush.bf16.msra.mxu2 %v1088_v0  ;;  %1187 = vmatpush.bf16.msra.mxu3 %v1088_v0  ;;  %v544_v4 = vld [vmem:[%s1441_s7 + $0x20] sm:$0xff]  ;;  %v542_v5 = vld [vmem:[%s1441_s7 + $0x10] sm:$0xff]  ;;  %v545_v8 = vld [vmem:[%s1441_s7 + $0x28] sm:$0xff]  ;;  %s231_s28 = sand.u32 1, %s1332_s13   ;;  %p1288_p13 = pnand %p1287_p12, %p1413_p4 }
  0x18   : > { %1267 = vset.pattern.permute.xlu0 %v1350_v1  ;;  %v540_v6 = vld [vmem:[%s1441_s7] sm:$0xff]  ;;  %594 = vperm.xlu2 %1269, %v544_v4   ;;  %v543_v9 = vld [vmem:[%s1441_s7 + $0x18] sm:$0xff]  ;;  %v541_v10 = vld [vmem:[%s1441_s7 + $0x8] sm:$0xff]  ;;  %s829_s15 = scalar_lea.sflag [#allocation3], %s231_s28  ;;  %s1290_s4 = scalar_lea.hbm %s1608_s3, 256 }
  0x19   : > { %584 = vperm.xlu1 %1268, %v542_v5   ;;  %574 = vperm.xlu0 %1267, %v540_v6   ;;  %v548_v13 = vld [vmem:[%s1441_s7 + $0x40] sm:$0xff]  ;;  %v547_v14 = vld [vmem:[%s1441_s7 + $0x38] sm:$0xff]  ;;  %v546_v15 = vld [vmem:[%s1441_s7 + $0x30] sm:$0xff]  ;;  %p1289_p0 = pneg %p1288_p13  ;;  %p1292_p2 = scmp.lt.s32.totalorder %s1290_s4, %s1286_s27 }
  0x1a   : > { %452 = vmatpush.bf16.msra.mxu0 %v1087_v2  ;;  %1188 = vmatpush.bf16.msra.mxu1 %v1087_v2  ;;  %v551_v18 = vld [vmem:[%s1441_s7 + $0x58] sm:$0xff]  ;;  %v550_v19 = vld [vmem:[%s1441_s7 + $0x50] sm:$0xff]  ;;  %v1065_v20 = vld [vmem:[%s1474_s8] sm:$0xff] }
  0x1b   : > { %1189 = vmatpush.bf16.msra.mxu2 %v1087_v2  ;;  %1190 = vmatpush.bf16.msra.mxu3 %v1087_v2  ;;  %v549_v21 = vld [vmem:[%s1441_s7 + $0x48] sm:$0xff]  ;;  %v1069_v22 = vld [vmem:[%s1474_s8 + $0x20] sm:$0xff]  ;;  %v554_v25 = vld [vmem:[%s1441_s7 + $0x70] sm:$0xff]  ;;  %p1293_p3 = por %p1292_p2, %p1291_p1 }
  0x1c   : > { %v1073_v23 = vld [vmem:[%s1474_s8 + $0x40] sm:$0xff]  ;;  %v553_v26 = vld [vmem:[%s1441_s7 + $0x68] sm:$0xff]  ;;  %v555_v31 = vld [vmem:[%s1441_s7 + $0x78] sm:$0xff] }
  0x1d   : > { %v1077_v24 = vld [vmem:[%s1474_s8 + $0x60] sm:$0xff]  ;;  %v557_v28 = vld [vmem:[%s1441_s7 + $0x88] sm:$0xff]  ;;  %v559_v36 = vld [vmem:[%s1441_s7 + $0x98] sm:$0xff]  ;;  %p1294_p5 = pnand %p1293_p3, %p1289_p0 }
  0x1e   : > { %453 = vmatpush.bf16.msra.mxu0 %v1086_v3  ;;  %1191 = vmatpush.bf16.msra.mxu1 %v1086_v3  ;;  %v552_v27 = vld [vmem:[%s1441_s7 + $0x60] sm:$0xff]  ;;  %v1066_v30 = vld [vmem:[%s1474_s8 + $0x8] sm:$0xff]  ;;  %v558_v37 = vld [vmem:[%s1441_s7 + $0x90] sm:$0xff] }
  0x1f   : > { %1192 = vmatpush.bf16.msra.mxu2 %v1086_v3  ;;  %1193 = vmatpush.bf16.msra.mxu3 %v1086_v3  ;;  %v556_v29 = vld [vmem:[%s1441_s7 + $0x80] sm:$0xff]  ;;  %v1070_v32 = vld [vmem:[%s1474_s8 + $0x28] sm:$0xff]  ;;  %v563_v38 = vld [vmem:[%s1441_s7 + $0xb8] sm:$0xff] }
  0x20   : > { %599 = vperm.xlu2 %1269, %v545_v8   ;;  %v1074_v33 = vld [vmem:[%s1474_s8 + $0x48] sm:$0xff]  ;;  %v560_v35 = vld [vmem:[%s1441_s7 + $0xa0] sm:$0xff]  ;;  %v562_v39 = vld [vmem:[%s1441_s7 + $0xb0] sm:$0xff] }
  0x21   : > { %589 = vperm.xlu1 %1268, %v543_v9   ;;  %579 = vperm.xlu0 %1267, %v541_v10   ;;  %v1078_v34 = vld [vmem:[%s1474_s8 + $0x68] sm:$0xff]  ;;  %v1067_v40 = vld [vmem:[%s1474_s8 + $0x10] sm:$0xff]  ;;  %v564_v47 = vld [vmem:[%s1441_s7 + $0xc0] sm:$0xff] }
  0x22   : > { %454 = vmatpush.bf16.msra.mxu0 %v1085_v7  ;;  %1194 = vmatpush.bf16.msra.mxu1 %v1085_v7  ;;  %v561_v41 = vld [vmem:[%s1441_s7 + $0xa8] sm:$0xff]  ;;  %v1071_v42 = vld [vmem:[%s1474_s8 + $0x30] sm:$0xff]  ;;  %v568_v49 = vld [vmem:[%s1441_s7 + $0xe0] sm:$0xff] }
  0x23   : > { %1195 = vmatpush.bf16.msra.mxu2 %v1085_v7  ;;  %1196 = vmatpush.bf16.msra.mxu3 %v1085_v7  ;;  %v1075_v43 = vld [vmem:[%s1474_s8 + $0x50] sm:$0xff]  ;;  %v565_v46 = vld [vmem:[%s1441_s7 + $0xc8] sm:$0xff]  ;;  %v1068_v50 = vld [vmem:[%s1474_s8 + $0x18] sm:$0xff] }
  0x24   : > { %v1079_v44 = vld [vmem:[%s1474_s8 + $0x70] sm:$0xff]  ;;  %v569_v48 = vld [vmem:[%s1441_s7 + $0xe8] sm:$0xff]  ;;  %v567_v51 = vld [vmem:[%s1441_s7 + $0xd8] sm:$0xff] }
  0x25   : > { %v566_v45 = vld [vmem:[%s1441_s7 + $0xd0] sm:$0xff]  ;;  %v1072_v52 = vld [vmem:[%s1474_s8 + $0x38] sm:$0xff] }
  0x26   : > { %455 = vmatpush.bf16.msra.mxu0 %v1084_v11  ;;  %1197 = vmatpush.bf16.msra.mxu1 %v1084_v11  ;;  %v1076_v53 = vld [vmem:[%s1474_s8 + $0x58] sm:$0xff]  ;;  %v570_v56 = vld [vmem:[%s1441_s7 + $0xf0] sm:$0xff] }
  0x27   : > { %1198 = vmatpush.bf16.msra.mxu2 %v1084_v11  ;;  %1199 = vmatpush.bf16.msra.mxu3 %v1084_v11  ;;  %v1080_v54 = vld [vmem:[%s1474_s8 + $0x78] sm:$0xff] }
  0x28   : > { %614 = vperm.xlu2 %1269, %v548_v13   ;;  %v571_v55 = vld [vmem:[%s1441_s7 + $0xf8] sm:$0xff]  ;;  %s959_s7 = sshll.u32 %s231_s28, 7 }
  0x29   : > { %609 = vperm.xlu1 %1268, %v547_v14   ;;  %604 = vperm.xlu0 %1267, %v546_v15   ;;  %s1534_s9 = scalar_lea.vmem [#allocation2], %s959_s7 }
  0x2a   : > { %456 = vmatpush.bf16.msra.mxu0 %v1083_v12  ;;  %1200 = vmatpush.bf16.msra.mxu1 %v1083_v12  ;;  %s842_s21 = sshll.u32 %s1534_s9, 4  ;;  %s843_s21 = int_to_ptr.vmem [resolvable:$true] %s842_s21 }
  0x2b   : > { %1201 = vmatpush.bf16.msra.mxu2 %v1083_v12  ;;  %1202 = vmatpush.bf16.msra.mxu3 %v1083_v12 }
  0x2e   : > { %457 = vmatpush.bf16.msra.mxu0 %v1082_v16  ;;  %1203 = vmatpush.bf16.msra.mxu1 %v1082_v16 }
  0x2f   : > { %1204 = vmatpush.bf16.msra.mxu2 %v1082_v16  ;;  %1205 = vmatpush.bf16.msra.mxu3 %v1082_v16 }
  0x30   : > { %629 = vperm.xlu2 %1269, %v551_v18  }
  0x31   : > { %624 = vperm.xlu1 %1268, %v550_v19   ;;  %619 = vperm.xlu0 %1267, %v549_v21  }
  0x32   : > { %458 = vmatpush.bf16.msra.mxu0 %v1081_v17  ;;  %1206 = vmatpush.bf16.msra.mxu1 %v1081_v17 }
  0x33   : > { %1207 = vmatpush.bf16.msra.mxu2 %v1081_v17  ;;  %1208 = vmatpush.bf16.msra.mxu3 %v1081_v17 }
  0x35   : > { %459 = vmatmul.bf16.vlgmr.msra.gmra.mxu0 %v1065_v20  ;;  %479 = vmatmul.bf16.vlgmr.msra.gmra.mxu1 %v1069_v22 }
  0x36   : > { %499 = vmatmul.bf16.vlgmr.msra.gmra.mxu2 %v1073_v23  ;;  %519 = vmatmul.bf16.vlgmr.msra.gmra.mxu3 %v1077_v24 }
  0x38   : > { %644 = vperm.xlu2 %1269, %v554_v25  }
  0x39   : > { %639 = vperm.xlu1 %1268, %v553_v26   ;;  %634 = vperm.xlu0 %1267, %v552_v27  }
  0x40   : > { %659 = vperm.xlu2 %1269, %v557_v28  }
  0x41   : > { %654 = vperm.xlu1 %1268, %v556_v29   ;;  %649 = vperm.xlu0 %1267, %v555_v31  }
  0x45   : > { %464 = vmatmul.bf16.gmra.mxu0 %v1066_v30  ;;  %484 = vmatmul.bf16.gmra.mxu1 %v1070_v32 }
  0x46   : > { %504 = vmatmul.bf16.gmra.mxu2 %v1074_v33  ;;  %524 = vmatmul.bf16.gmra.mxu3 %v1078_v34 }
  0x48   : > { %674 = vperm.xlu2 %1269, %v560_v35  }
  0x49   : > { %669 = vperm.xlu1 %1268, %v559_v36   ;;  %664 = vperm.xlu0 %1267, %v558_v37  }
  0x50   : > { %689 = vperm.xlu2 %1269, %v563_v38  }
  0x51   : > { %684 = vperm.xlu1 %1268, %v562_v39   ;;  %679 = vperm.xlu0 %1267, %v561_v41  }
  0x55   : > { %469 = vmatmul.bf16.gmra.mxu0 %v1067_v40  ;;  %489 = vmatmul.bf16.gmra.mxu1 %v1071_v42 }
  0x56   : > { %509 = vmatmul.bf16.gmra.mxu2 %v1075_v43  ;;  %529 = vmatmul.bf16.gmra.mxu3 %v1079_v44 }
  0x58   : > { %704 = vperm.xlu2 %1269, %v566_v45  }
  0x59   : > { %699 = vperm.xlu1 %1268, %v565_v46   ;;  %694 = vperm.xlu0 %1267, %v564_v47  }
  0x60   : > { %719 = vperm.xlu2 %1269, %v569_v48  }
  0x61   : > { %714 = vperm.xlu1 %1268, %v568_v49   ;;  %709 = vperm.xlu0 %1267, %v567_v51  }
  0x65   : > { %474 = vmatmul.bf16.gmra.mxu0 %v1068_v50  ;;  %494 = vmatmul.bf16.gmra.mxu1 %v1072_v52 }
  0x66   : > { %514 = vmatmul.bf16.gmra.mxu2 %v1076_v53  ;;  %534 = vmatmul.bf16.gmra.mxu3 %v1080_v54 }
  0x69   : > { %729 = vperm.xlu1 %1268, %v571_v55   ;;  %724 = vperm.xlu0 %1267, %v570_v56  }
  0x72   : > { %v1515_v57 = vpop.permute.xlu2 %594 }
  0x7a   : > { %v1517_v59 = vpop.permute.xlu2 %599 }
  0x82   : > { %v615_v63 = vpop.permute.xlu2 %614 }
  0x8a   : > { %v630_v2 = vpop.permute.xlu2 %629 }
  0x8b   : > { %v585_v58 = vpop.permute.xlu1 %584  ;;  %v575_v60 = vpop.permute.xlu0 %574 }
  0x92   : > { %v1523_v5 = vpop.permute.xlu2 %644 }
  0x93   : > { %v590_v61 = vpop.permute.xlu1 %589  ;;  %v580_v62 = vpop.permute.xlu0 %579 }
  0x9a   : > { %v660_v11 = vpop.permute.xlu2 %659 }
  0x9b   : > { %v1519_v0 = vpop.permute.xlu1 %609  ;;  %v1521_v1 = vpop.permute.xlu0 %604 }
  0xa2   : > { %v675_v25 = vpop.permute.xlu2 %674 }
  0xa3   : > { %v625_v3 = vpop.permute.xlu1 %624  ;;  %v620_v4 = vpop.permute.xlu0 %619 }
  0xaa   : > { %v1541_v41 = vpop.permute.xlu2 %689 }
  0xab   : > { %v1525_v6 = vpop.permute.xlu1 %639  ;;  %v1527_v7 = vpop.permute.xlu0 %634 }
  0xb2   : > { %v460_v8 = vpop.f32.mrf.mxu0  ;;  %v480_v9 = vpop.f32.mrf.mxu1 }
  0xb3   : > { %v655_v10 = vpop.permute.xlu1 %654  ;;  %v1530_v12 = vpop.permute.xlu0 %649  ;;  %v732_v16 = vmul.f32 %v575_v60, %v460_v8  ;;  %v740_v19 = vmul.f32 %v615_v63, %v480_v9 }
  0xb4   : > { %v705_v60 = vpop.permute.xlu2 %704 }
  0xb9   : > { %v500_v13 = vpop.f32.mrf.mxu2  ;;  %v520_v14 = vpop.f32.mrf.mxu3 }
  0xba   : > { %v462_v15 = vpop.f32.mrf.mxu0  ;;  %v482_v18 = vpop.f32.mrf.mxu1  ;;  %v748_v27 = vmul.f32 %v655_v10, %v500_v13 }
  0xbb   : > { %v733_v17 = vmul.f32 %v580_v62, %v462_v15  ;;  %v741_v20 = vmul.f32 %v620_v4, %v482_v18  ;;  %v670_v23 = vpop.permute.xlu1 %669  ;;  %v665_v24 = vpop.permute.xlu0 %664 }
  0xbd   : > { %v1093_v21 = vpack.c.bf16 %v733_v17, %v732_v16  ;;  %v1113_v22 = vpack.c.bf16 %v741_v20, %v740_v19  ;;  %v720_v17 = vpop.permute.xlu2 %719 }
  0xbf   : > { %1094 = vst [vmem:[%s1534_s9] sm:$0xff] %v1093_v21  }
  0xc0   : > { %1173 = vst [vmem:[%s1534_s9 + $0x20] sm:$0xff] %v1113_v22  }
  0xc1   : > { %v502_v26 = vpop.f32.mrf.mxu2  ;;  %v522_v29 = vpop.f32.mrf.mxu3 }
  0xc2   : > { %v749_v28 = vmul.f32 %v660_v11, %v502_v26  ;;  %v465_v30 = vpop.f32.mrf.mxu0  ;;  %v485_v31 = vpop.f32.mrf.mxu1 }
  0xc3   : > { %v1539_v33 = vpop.permute.xlu1 %684  ;;  %v680_v34 = vpop.permute.xlu0 %679  ;;  %v734_v38 = vmul.f32 %v585_v58, %v465_v30  ;;  %v742_v42 = vmul.f32 %v625_v3, %v485_v31 }
  0xc4   : > { %v1133_v32 = vpack.c.bf16 %v749_v28, %v748_v27 }
  0xc6   : > { %1177 = vst [vmem:[%s1534_s9 + $0x40] sm:$0xff] %v1133_v32  }
  0xc9   : > { %v505_v35 = vpop.f32.mrf.mxu2  ;;  %v525_v36 = vpop.f32.mrf.mxu3 }
  0xca   : > { %v467_v37 = vpop.f32.mrf.mxu0  ;;  %v487_v40 = vpop.f32.mrf.mxu1  ;;  %v750_v51 = vmul.f32 %v665_v24, %v505_v35  ;;  %v758_v62 = vmul.f32 %v705_v60, %v525_v36 }
  0xcb   : > { %v735_v39 = vmul.f32 %v590_v61, %v467_v37  ;;  %v743_v43 = vmul.f32 %v630_v2, %v487_v40  ;;  %v700_v46 = vpop.permute.xlu1 %699  ;;  %v695_v48 = vpop.permute.xlu0 %694 }
  0xcc   : > { %v757_v47 = vmul.f32 %v700_v46, %v522_v29  ;;  %v756_v49 = vmul.f32 %v695_v48, %v520_v14 }
  0xcd   : > { %v1098_v44 = vpack.c.bf16 %v735_v39, %v734_v38  ;;  %v1118_v45 = vpack.c.bf16 %v743_v43, %v742_v42 }
  0xce   : > { %v1153_v52 = vpack.c.bf16 %v757_v47, %v756_v49 }
  0xcf   : > { %1170 = vst [vmem:[%s1534_s9 + $0x8] sm:$0xff] %v1098_v44  }
  0xd0   : > { %1174 = vst [vmem:[%s1534_s9 + $0x28] sm:$0xff] %v1118_v45  }
  0xd1   : > { %v507_v50 = vpop.f32.mrf.mxu2  ;;  %v527_v54 = vpop.f32.mrf.mxu3  ;;  %1181 = vst [vmem:[%s1534_s9 + $0x60] sm:$0xff] %v1153_v52  }
  0xd2   : > { %v751_v53 = vmul.f32 %v670_v23, %v507_v50  ;;  %v470_v55 = vpop.f32.mrf.mxu0  ;;  %v490_v56 = vpop.f32.mrf.mxu1 }
  0xd3   : > { %v710_v61 = vpop.permute.xlu0 %709  ;;  %v736_v9 = vmul.f32 %v1515_v57, %v470_v55  ;;  %v744_v13 = vmul.f32 %v1527_v7, %v490_v56  ;;  %v715_v18 = vpop.permute.xlu1 %714 }
  0xd4   : > { %v1138_v58 = vpack.c.bf16 %v751_v53, %v750_v51  ;;  %v759_v63 = vmul.f32 %v710_v61, %v527_v54 }
  0xd6   : > { %1178 = vst [vmem:[%s1534_s9 + $0x48] sm:$0xff] %v1138_v58   ;;  %v1158_v3 = vpack.c.bf16 %v759_v63, %v758_v62 }
  0xd8   : > { %1182 = vst [vmem:[%s1534_s9 + $0x68] sm:$0xff] %v1158_v3  }
  0xd9   : > { %v510_v2 = vpop.f32.mrf.mxu2  ;;  %v530_v4 = vpop.f32.mrf.mxu3 }
  0xda   : > { %v472_v8 = vpop.f32.mrf.mxu0  ;;  %v492_v11 = vpop.f32.mrf.mxu1  ;;  %v752_v20 = vmul.f32 %v675_v25, %v510_v2  ;;  %v760_v22 = vmul.f32 %v715_v18, %v530_v4 }
  0xdb   : > { %v737_v10 = vmul.f32 %v1517_v59, %v472_v8  ;;  %v745_v14 = vmul.f32 %v1525_v6, %v492_v11  ;;  %v730_v36 = vpop.permute.xlu1 %729 }
  0xdd   : > { %v1103_v15 = vpack.c.bf16 %v737_v10, %v736_v9  ;;  %v1123_v16 = vpack.c.bf16 %v745_v14, %v744_v13 }
  0xdf   : > { %1171 = vst [vmem:[%s1534_s9 + $0x10] sm:$0xff] %v1103_v15  }
  0xe0   : > { %1175 = vst [vmem:[%s1534_s9 + $0x30] sm:$0xff] %v1123_v16  }
  0xe1   : > { %v512_v19 = vpop.f32.mrf.mxu2  ;;  %v532_v57 = vpop.f32.mrf.mxu3 }
  0xe2   : > { %v753_v21 = vmul.f32 %v680_v34, %v512_v19  ;;  %v475_v59 = vpop.f32.mrf.mxu0  ;;  %v761_v23 = vmul.f32 %v720_v17, %v532_v57  ;;  %v495_v7 = vpop.f32.mrf.mxu1 }
  0xe3   : > { %v738_v29 = vmul.f32 %v1521_v1, %v475_v59  ;;  %v746_v31 = vmul.f32 %v1523_v5, %v495_v7 }
  0xe4   : > { %v1143_v24 = vpack.c.bf16 %v753_v21, %v752_v20  ;;  %v1163_v6 = vpack.c.bf16 %v761_v23, %v760_v22 }
  0xe6   : > { %1179 = vst [vmem:[%s1534_s9 + $0x50] sm:$0xff] %v1143_v24  }
  0xe7   : > { %1183 = vst [vmem:[%s1534_s9 + $0x70] sm:$0xff] %v1163_v6  }
  0xe9   : > { %v515_v26 = vpop.f32.mrf.mxu2  ;;  %v535_v27 = vpop.f32.mrf.mxu3 }
  0xea   : > { %v477_v28 = vpop.f32.mrf.mxu0  ;;  %v497_v30 = vpop.f32.mrf.mxu1  ;;  %v754_v5 = vmul.f32 %v1539_v33, %v515_v26 }
  0xeb   : > { %v739_v25 = vmul.f32 %v1519_v0, %v477_v28  ;;  %v747_v32 = vmul.f32 %v1530_v12, %v497_v30  ;;  %v725_v0 = vpop.permute.xlu0 %724 }
  0xec   : > { %v762_v38 = vmul.f32 %v725_v0, %v535_v27 }
  0xed   : > { %v1108_v34 = vpack.c.bf16 %v739_v25, %v738_v29  ;;  %v1128_v35 = vpack.c.bf16 %v747_v32, %v746_v31 }
  0xef   : > { %1172 = vst [vmem:[%s1534_s9 + $0x18] sm:$0xff] %v1108_v34  }
  0xf0   : > { %1176 = vst [vmem:[%s1534_s9 + $0x38] sm:$0xff] %v1128_v35  }
  0xf1   : > { %v517_v1 = vpop.f32.mrf.mxu2  ;;  %v537_v37 = vpop.f32.mrf.mxu3 }
  0xf2   : > { %v755_v12 = vmul.f32 %v1541_v41, %v517_v1  ;;  %v763_v39 = vmul.f32 %v730_v36, %v537_v37 }
  0xf4   : > { %v1148_v40 = vpack.c.bf16 %v755_v12, %v754_v5  ;;  %v1168_v42 = vpack.c.bf16 %v763_v39, %v762_v38 }
  0xf6   : > { %1180 = vst [vmem:[%s1534_s9 + $0x58] sm:$0xff] %v1148_v40  }
  0xf7   : > { %1184 = vst [vmem:[%s1534_s9 + $0x78] sm:$0xff] %v1168_v42  }
  0xf8   : > { %1297 = shalt.err (!%p1294_p5)
}
  0xf9   : > { %s1351_s8 = smov 64   ;;  %s1352_s28 = smov 4  }
  0xfa   : > { %1209 = dma.vmem_to_hbm [thread:$0]  (%p1413_p4), %s843_s21, 2048, %s845_s23, %s829_s15, %s1351_s8, %s1351_s8, %s1352_s28  }
  0xfb PF: > { %p1215_p6 = scmp.ge.s32.totalorder %s1348_s17, 2  ;;  %s859_s7 = sand.u32 1, %s1328_s12  }
  0xfc   : > { %s860_s9 = scalar_lea.sflag [#allocation3], %s859_s7 }
  0xfd   : > { %p1212_p7 = pnand %p1215_p6, %p1420_p8 }
  0xff   : > { %p1213_p9 = pneg %p1212_p7 }
 0x101   : > { %1323 = dma.done.wait (%p1213_p9), %s860_s9, 2048  }
 0x102   : > { %1325 = vsyncadd (%p1213_p9), %s860_s9, 4294965248  ;;  %s16_s17 = sadd.s32 1, %s1348_s17   ;;  %s1611_s12 = smov %s1332_s13 }
 0x103   : > { %p13_p10 = scmp.ge.s32.totalorder %s16_s17, 4   ;;  %s1612_s13 = smov %s1336_s14 }
 0x104   : > { %s1613_s14 = smov %s1426_s25  ;;  %s1614_s15 = smov %s1344_s16 }
 0x105   : > { %s1615_s16 = smov %s1617_s20  ;;  %15 = sbr.rel (!%p13_p10) target bundleno = 4 (0x4), region = 73 }
 0x10a   :  { %866 = vsyncpa [#allocation3], 1 }
 0x10b   :  { %868 = vsyncpa [#allocation3 + $0x1], 1 }

</bundles_post_ra>
